<compile_context>
chip_gen: v7x
topology: tpu7x:2x2x1
jax: 0.10.0
libtpu: 0.0.40
codegen_flags: <defaults>
</compile_context>

<pallas_src>
import functools

import jax
import jax.numpy as jnp
from jax.experimental import pallas as pl
from jax.experimental.pallas import tpu as pltpu

LANE = 128
SUBLANE = 8


def _round_up(n, m):
    return ((n + m - 1) // m) * m


def mlp_kernel(x_ref, w1_ref, b1_ref, w2_ref, b2_ref, w3_ref, b3_ref, o_ref):
    # Whole forward pass fused in one kernel invocation (per batch tile).
    x = x_ref[...]

    # Biases read once per invocation (hoisted; JAX does not CSE broadcasts).
    b1 = b1_ref[...]
    b2 = b2_ref[...]
    b3 = b3_ref[...]

    # Layer 1: Linear + ReLU   (bf16 MXU feed, f32 accumulate / epilogue)
    h1 = jnp.dot(x, w1_ref[...], preferred_element_type=jnp.float32) + b1
    h1 = jnp.maximum(h1, 0.0).astype(x.dtype)

    # Layer 2: Linear + ReLU
    h2 = jnp.dot(h1, w2_ref[...], preferred_element_type=jnp.float32) + b2
    h2 = jnp.maximum(h2, 0.0).astype(x.dtype)

    # Layer 3: Linear + Sigmoid.  Output is only 8 padded columns wide, so the f32 store,
    # bias add and sigmoid are 16x cheaper than with 128-lane padding.
    logits = jnp.dot(h2, w3_ref[...], preferred_element_type=jnp.float32) + b3
    o_ref[...] = jax.nn.sigmoid(logits)


def prepare_params(w1, b1, w2, b2, w3, b3, compute_dtype=jnp.bfloat16):
    """Pad/cast the (tiny, VMEM-resident) weights ONCE, outside the per-call path.

    Hidden dim is padded to a lane multiple (116 -> 128); the output dim only to one
    f32 sublane tile (1 -> 8).  Zero padding keeps the math identical: padded hidden
    columns are relu(0 + 0) = 0 and padded weight rows are 0.
    """
    in_dim, hid_dim = w1.shape
    out_dim = w3.shape[1]
    hid_p = _round_up(hid_dim, LANE)
    out_p = _round_up(out_dim, SUBLANE)

    w1_p = jnp.zeros((in_dim, hid_p), compute_dtype).at[:, :hid_dim].set(
        w1.astype(compute_dtype))
    b1_p = jnp.zeros((1, hid_p), jnp.float32).at[:, :hid_dim].set(
        b1.reshape(1, -1).astype(jnp.float32))
    w2_p = jnp.zeros((hid_p, hid_p), compute_dtype).at[:hid_dim, :hid_dim].set(
        w2.astype(compute_dtype))
    b2_p = jnp.zeros((1, hid_p), jnp.float32).at[:, :hid_dim].set(
        b2.reshape(1, -1).astype(jnp.float32))
    w3_p = jnp.zeros((hid_p, out_p), compute_dtype).at[:hid_dim, :out_dim].set(
        w3.astype(compute_dtype))
    b3_p = jnp.zeros((1, out_p), jnp.float32).at[:, :out_dim].set(
        b3.reshape(1, -1).astype(jnp.float32))
    return (w1_p, b1_p, w2_p, b2_p, w3_p, b3_p), out_dim


@functools.partial(jax.jit,
                   static_argnames=("out_dim", "block_batch", "compute_dtype"))
def mushroom_forward(x, w1_p, b1_p, w2_p, b2_p, w3_p, b3_p, *, out_dim,
                     block_batch=None, compute_dtype=jnp.bfloat16):
    """Forward pass.  Params must come from prepare_params (already padded / cast)."""
    batch, in_dim = x.shape
    hid_p = w1_p.shape[1]
    out_p = w3_p.shape[1]

    # Batch tile: per-grid-step fixed overhead (~0.35 us) dominates small tiles, so
    # collapse small/medium batches to a single grid step and cap at 4096 rows for
    # large batches, which keeps double-buffered I/O + f32 intermediates well inside
    # v7x's 32 MiB default scoped VMEM (v5e/v6e have 128 MiB and more headroom).
    if block_batch is None:
        block_batch = min(batch, 4096)
    block_batch = max(SUBLANE, _round_up(block_batch, SUBLANE))
    batch_p = _round_up(batch, block_batch)

    # Only cast to bf16 (and pad batch rows if the batch is not a tile multiple).
    # No feature-dim padding of x: the kernel consumes the full 117-wide row directly.
    x_c = x.astype(compute_dtype)
    if batch_p != batch:
        x_c = jnp.zeros((batch_p, in_dim), compute_dtype).at[:batch].set(x_c)

    grid = (batch_p // block_batch,)

    itemsize = jnp.dtype(compute_dtype).itemsize
    weight_elems = in_dim * hid_p + hid_p * hid_p + hid_p * out_p
    cost = pl.CostEstimate(
        flops=2 * batch_p * weight_elems,
        transcendentals=batch_p * out_p,  # sigmoid
        bytes_accessed=(batch_p * in_dim * itemsize        # x (bf16)
                        + weight_elems * itemsize          # weights (bf16)
                        + (2 * hid_p + out_p) * 4          # biases (f32)
                        + batch_p * out_p * 4),            # output (f32, 8 lanes)
    )

    out_padded = pl.pallas_call(
        mlp_kernel,
        out_shape=jax.ShapeDtypeStruct((batch_p, out_p), jnp.float32),
        grid_spec=pl.GridSpec(
            grid=grid,
            in_specs=[
                # batch tile of the (bf16) input; last dim == full array dim (117)
                pl.BlockSpec((block_batch, in_dim), lambda i: (i, 0)),
                # weights / biases: same block every grid step -> VMEM-resident
                pl.BlockSpec((in_dim, hid_p), lambda i: (0, 0)),
                pl.BlockSpec((1, hid_p), lambda i: (0, 0)),
                pl.BlockSpec((hid_p, hid_p), lambda i: (0, 0)),
                pl.BlockSpec((1, hid_p), lambda i: (0, 0)),
                pl.BlockSpec((hid_p, out_p), lambda i: (0, 0)),
                pl.BlockSpec((1, out_p), lambda i: (0, 0)),
            ],
            out_specs=pl.BlockSpec((block_batch, out_p), lambda i: (i, 0)),
        ),
        compiler_params=pltpu.CompilerParams(
            dimension_semantics=("parallel",),
        ),
        cost_estimate=cost,
    )(x_c, w1_p, b1_p, w2_p, b2_p, w3_p, b3_p)

    # Strip batch padding and the 7 padded output columns (which are sigmoid(0) = 0.5).
    return out_padded[:batch, :out_dim]


def init_params(key, input_nodes, hidden_nodes, output_nodes):
    """PyTorch-style (uniform +/- 1/sqrt(fan_in)) init. Weights stored as [in, out]
    (transposed relative to torch.nn.Linear.weight, which is [out, in])."""
    ks = jax.random.split(key, 6)

    def linear(kw, kb, fan_in, fan_out):
        bound = 1.0 / jnp.sqrt(float(fan_in))
        w = jax.random.uniform(kw, (fan_in, fan_out), jnp.float32, -bound, bound)
        b = jax.random.uniform(kb, (1, fan_out), jnp.float32, -bound, bound)
        return w, b

    w1, b1 = linear(ks[0], ks[1], input_nodes, hidden_nodes)
    w2, b2 = linear(ks[2], ks[3], hidden_nodes, hidden_nodes)
    w3, b3 = linear(ks[4], ks[5], hidden_nodes, output_nodes)
    return w1, b1, w2, b2, w3, b3


def reference_forward(x, w1, b1, w2, b2, w3, b3, compute_dtype=jnp.float32):
    """Pure-JAX reference. compute_dtype=bfloat16 mirrors the kernel's bf16-feed /
    f32-accumulate math; float32 matches the original PyTorch module exactly."""
    cd = compute_dtype
    h1 = jnp.dot(x.astype(cd), w1.astype(cd), preferred_element_type=jnp.float32) + b1
    h1 = jnp.maximum(h1, 0.0)
    h2 = jnp.dot(h1.astype(cd), w2.astype(cd), preferred_element_type=jnp.float32) + b2
    h2 = jnp.maximum(h2, 0.0)
    logits = jnp.dot(h2.astype(cd), w3.astype(cd), preferred_element_type=jnp.float32) + b3
    return jax.nn.sigmoid(logits)


if __name__ == "__main__":
    # Shapes implied by the module: one-hot mushroom features (117 after get_dummies),
    # hidden_nodes = 116, output_nodes = 1 (binary edible/poisonous).
    input_nodes, hidden_nodes, output_nodes = 117, 116, 1
    batch = 256

    key = jax.random.PRNGKey(0)
    k_x, k_p = jax.random.split(key)

    # Synthetic one-hot-ish input (0/1 floats), like the pd.get_dummies encoding.
    x = (jax.random.uniform(k_x, (batch, input_nodes)) > 0.5).astype(jnp.float32)

    params = init_params(k_p, input_nodes, hidden_nodes, output_nodes)

    # Pad/cast weights once (hoisted out of the per-call path).
    padded_params, out_dim = prepare_params(*params)
    padded_params = jax.block_until_ready(padded_params)

    out = mushroom_forward(x, *padded_params, out_dim=out_dim)
    out = jax.block_until_ready(out)
    assert out.shape == (batch, output_nodes)

    # Check against a reference using the same bf16-feed / f32-accumulate math
    # (also validates that the partial K=117 contraction tile is zero-filled).
    ref_bf16 = reference_forward(x, *params, compute_dtype=jnp.bfloat16)
    assert jnp.allclose(out, ref_bf16, atol=2e-3, rtol=1e-3), "mismatch vs bf16 reference"

    # And against the pure-f32 PyTorch-semantics reference (only bf16 cast error remains).
    ref_f32 = reference_forward(x, *params, compute_dtype=jnp.float32)
    assert jnp.allclose(out, ref_f32, atol=2e-2, rtol=0.0), "mismatch vs f32 reference"

    print("KERNEL_OK")
</pallas_src>

<mosaic_0001>
module attributes {stable_mosaic.version = 11 : i64} {
  func.func @mlp_kernel(%arg0: i32, %arg1: memref<256x117xbf16, #tpu.memory_space<vmem>>, %arg2: memref<117x128xbf16, #tpu.memory_space<vmem>>, %arg3: memref<1x128xf32, #tpu.memory_space<vmem>>, %arg4: memref<128x128xbf16, #tpu.memory_space<vmem>>, %arg5: memref<1x128xf32, #tpu.memory_space<vmem>>, %arg6: memref<128x8xbf16, #tpu.memory_space<vmem>>, %arg7: memref<1x8xf32, #tpu.memory_space<vmem>>, %arg8: memref<256x8xf32, #tpu.memory_space<vmem>>) attributes {dimension_semantics = [#tpu.dimension_semantics<parallel>], iteration_bounds = array<i64: 1>, scalar_prefetch = 0 : i64, scratch_operands = 0 : i64, tpu.core_type = #tpu.core_type<tc>, window_params = [{transform_indices = @transform_0, window_bounds = array<i64: 256, 117>}, {pipeline_mode = #tpu.pipeline_mode<synchronous>, transform_indices = @transform_1, window_bounds = array<i64: 117, 128>}, {pipeline_mode = #tpu.pipeline_mode<synchronous>, transform_indices = @transform_2, window_bounds = array<i64: 1, 128>}, {pipeline_mode = #tpu.pipeline_mode<synchronous>, transform_indices = @transform_3, window_bounds = array<i64: 128, 128>}, {pipeline_mode = #tpu.pipeline_mode<synchronous>, transform_indices = @transform_4, window_bounds = array<i64: 1, 128>}, {pipeline_mode = #tpu.pipeline_mode<synchronous>, transform_indices = @transform_5, window_bounds = array<i64: 128, 8>}, {pipeline_mode = #tpu.pipeline_mode<synchronous>, transform_indices = @transform_6, window_bounds = array<i64: 1, 8>}, {transform_indices = @transform_7, window_bounds = array<i64: 256, 8>}]} {
    %c0 = arith.constant 0 : index
    %c0_0 = arith.constant 0 : index
    %0 = vector.load %arg1[%c0, %c0_0] : memref<256x117xbf16, #tpu.memory_space<vmem>>, vector<256x117xbf16>
    %c0_1 = arith.constant 0 : index
    %c0_2 = arith.constant 0 : index
    %1 = vector.load %arg3[%c0_1, %c0_2] : memref<1x128xf32, #tpu.memory_space<vmem>>, vector<1x128xf32>
    %c0_3 = arith.constant 0 : index
    %c0_4 = arith.constant 0 : index
    %2 = vector.load %arg5[%c0_3, %c0_4] : memref<1x128xf32, #tpu.memory_space<vmem>>, vector<1x128xf32>
    %c0_5 = arith.constant 0 : index
    %c0_6 = arith.constant 0 : index
    %3 = vector.load %arg7[%c0_5, %c0_6] : memref<1x8xf32, #tpu.memory_space<vmem>>, vector<1x8xf32>
    %c0_7 = arith.constant 0 : index
    %c0_8 = arith.constant 0 : index
    %4 = vector.load %arg2[%c0_7, %c0_8] : memref<117x128xbf16, #tpu.memory_space<vmem>>, vector<117x128xbf16>
    %cst = arith.constant dense<0.000000e+00> : vector<256x128xf32>
    %5 = tpu.matmul %0, %4, %cst {dimension_numbers = #tpu.dot_dimension_numbers<[1], [0], [0], [1], [0, 0, 1, 1], [], []>} : vector<256x117xbf16>, vector<117x128xbf16>, vector<256x128xf32> -> vector<256x128xf32>
    %6 = vector.broadcast %1 : vector<1x128xf32> to vector<256x128xf32>
    %7 = arith.addf %5, %6 : vector<256x128xf32>
    %cst_9 = arith.constant 0.000000e+00 : f32
    %8 = vector.broadcast %cst_9 : f32 to vector<256x128xf32>
    %9 = arith.maximumf %7, %8 : vector<256x128xf32>
    %10 = arith.truncf %9 : vector<256x128xf32> to vector<256x128xbf16>
    %c0_10 = arith.constant 0 : index
    %c0_11 = arith.constant 0 : index
    %11 = vector.load %arg4[%c0_10, %c0_11] : memref<128x128xbf16, #tpu.memory_space<vmem>>, vector<128x128xbf16>
    %cst_12 = arith.constant dense<0.000000e+00> : vector<256x128xf32>
    %12 = tpu.matmul %10, %11, %cst_12 {dimension_numbers = #tpu.dot_dimension_numbers<[1], [0], [0], [1], [0, 0, 1, 1], [], []>} : vector<256x128xbf16>, vector<128x128xbf16>, vector<256x128xf32> -> vector<256x128xf32>
    %13 = vector.broadcast %2 : vector<1x128xf32> to vector<256x128xf32>
    %14 = arith.addf %12, %13 : vector<256x128xf32>
    %cst_13 = arith.constant 0.000000e+00 : f32
    %15 = vector.broadcast %cst_13 : f32 to vector<256x128xf32>
    %16 = arith.maximumf %14, %15 : vector<256x128xf32>
    %17 = arith.truncf %16 : vector<256x128xf32> to vector<256x128xbf16>
    %c0_14 = arith.constant 0 : index
    %c0_15 = arith.constant 0 : index
    %18 = vector.load %arg6[%c0_14, %c0_15] : memref<128x8xbf16, #tpu.memory_space<vmem>>, vector<128x8xbf16>
    %cst_16 = arith.constant dense<0.000000e+00> : vector<256x8xf32>
    %19 = tpu.matmul %17, %18, %cst_16 {dimension_numbers = #tpu.dot_dimension_numbers<[1], [0], [0], [1], [0, 0, 1, 1], [], []>} : vector<256x128xbf16>, vector<128x8xbf16>, vector<256x8xf32> -> vector<256x8xf32>
    %20 = vector.broadcast %3 : vector<1x8xf32> to vector<256x8xf32>
    %21 = arith.addf %19, %20 : vector<256x8xf32>
    %22 = arith.negf %21 : vector<256x8xf32>
    %23 = math.exp %22 : vector<256x8xf32>
    %cst_17 = arith.constant 1.000000e+00 : f32
    %24 = vector.broadcast %cst_17 : f32 to vector<256x8xf32>
    %25 = arith.addf %24, %23 : vector<256x8xf32>
    %26 = arith.divf %24, %25 : vector<256x8xf32>
    %c0_18 = arith.constant 0 : index
    %c0_19 = arith.constant 0 : index
    %27 = vector.load %arg8[%c0_18, %c0_19] : memref<256x8xf32, #tpu.memory_space<vmem>>, vector<256x8xf32>
    tpu.vector_store %arg8[%c0_18, %c0_19], %26 {strides = array<i32>} : memref<256x8xf32, #tpu.memory_space<vmem>>, vector<256x8xf32>,
    return
  }
  func.func @transform_0(%arg0: i32) -> (i32, i32) {
    %c0_i32 = arith.constant 0 : i32
    %c0_i32_0 = arith.constant 0 : i32
    return %arg0, %c0_i32 : i32, i32
  }
  func.func @transform_1(%arg0: i32) -> (i32, i32) {
    %c0_i32 = arith.constant 0 : i32
    %c0_i32_0 = arith.constant 0 : i32
    %c0_i32_1 = arith.constant 0 : i32
    return %c0_i32, %c0_i32_0 : i32, i32
  }
  func.func @transform_2(%arg0: i32) -> (i32, i32) {
    %c0_i32 = arith.constant 0 : i32
    %c0_i32_0 = arith.constant 0 : i32
    %c0_i32_1 = arith.constant 0 : i32
    return %c0_i32, %c0_i32_0 : i32, i32
  }
  func.func @transform_3(%arg0: i32) -> (i32, i32) {
    %c0_i32 = arith.constant 0 : i32
    %c0_i32_0 = arith.constant 0 : i32
    %c0_i32_1 = arith.constant 0 : i32
    return %c0_i32, %c0_i32_0 : i32, i32
  }
  func.func @transform_4(%arg0: i32) -> (i32, i32) {
    %c0_i32 = arith.constant 0 : i32
    %c0_i32_0 = arith.constant 0 : i32
    %c0_i32_1 = arith.constant 0 : i32
    return %c0_i32, %c0_i32_0 : i32, i32
  }
  func.func @transform_5(%arg0: i32) -> (i32, i32) {
    %c0_i32 = arith.constant 0 : i32
    %c0_i32_0 = arith.constant 0 : i32
    %c0_i32_1 = arith.constant 0 : i32
    return %c0_i32, %c0_i32_0 : i32, i32
  }
  func.func @transform_6(%arg0: i32) -> (i32, i32) {
    %c0_i32 = arith.constant 0 : i32
    %c0_i32_0 = arith.constant 0 : i32
    %c0_i32_1 = arith.constant 0 : i32
    return %c0_i32, %c0_i32_0 : i32, i32
  }
  func.func @transform_7(%arg0: i32) -> (i32, i32) {
    %c0_i32 = arith.constant 0 : i32
    %c0_i32_0 = arith.constant 0 : i32
    return %arg0, %c0_i32 : i32, i32
  }
}

</mosaic_0001>

<bundles_post_ra>
// kernel: mushroom_forward.1
= control target key start
LH: loop header
LB: loop body
LE: loop exit
PB: predicated region body
PF: predicated region fallthrough
CT: control target
= control target key end

     0   :  { %vm208_vm0 = vcmask 957440   ;;  %vm257_vm1 = vcmask 1041408   ;;  %vm258_vm2 = vcmask 1042432   ;;  %v1704_v9 = vmov 65535   ;;  %s2132_s1 = inlined_call_operand.vmem [shape: bf16[117,128], index: 1, kind: input, shape index: {}]   ;;  %s2133_s0 = inlined_call_operand.vmem [shape: bf16[256,117], index: 0, kind: input, shape index: {}]   ;;  %s2134_s3 = inlined_call_operand.vmem [shape: bf16[128,128], index: 3, kind: input, shape index: {}]   ;;  %s2135_s5 = inlined_call_operand.vmem [shape: bf16[128,8], index: 5, kind: input, shape index: {}]   ;;  %s2136_s2 = inlined_call_operand.vmem [shape: f32[1,128], index: 2, kind: input, shape index: {}]   ;;  %s2137_s4 = inlined_call_operand.vmem [shape: f32[1,128], index: 4, kind: input, shape index: {}]   ;;  %s2138_s6 = inlined_call_operand.vmem [shape: f32[1,8], index: 6, kind: input, shape index: {}]   ;;  %s2139_s7 = inlined_call_operand.vmem [shape: f32[256,8], index: 7, kind: output, shape index: {}]  }
   0x1   :  { %v1536_v0 = vld [vmem:[%s2132_s1] sm:$0xff]   ;;  %v1537_v1 = vld [vmem:[%s2132_s1 + $0x8] sm:$0xff]   ;;  %v1538_v2 = vld [vmem:[%s2132_s1 + $0x10] sm:$0xff]   ;;  %v259_v10 = vsel %vm257_vm1, 4294967295, %v1704_v9  ;;  %vm1175_vm3 = vcmask 64512  }
   0x2   :  { %1375 = vmatprep.subr.bf16.mxu0 %v1536_v0  ;;  %1519 = vmatprep.subr.bf16.mxu1 %v1536_v0  ;;  %v1539_v3 = vld [vmem:[%s2132_s1 + $0x18] sm:$0xff]   ;;  %v1544_v4 = vld [vmem:[%s2133_s0] sm:$0xff]   ;;  %v1541_v6 = vld [vmem:[%s2132_s1 + $0x28] sm:$0xff]   ;;  %v260_v12 = vsel %vm258_vm2, %v259_v10, 0 }
   0x3   :  { %1376 = vmatpush3.bf16.msra.mxu0 %v1536_v0  ;;  %1527 = vmatpush3.bf16.msra.mxu1 %v1536_v0  ;;  %v1540_v5 = vld [vmem:[%s2132_s1 + $0x20] sm:$0xff]   ;;  %v1543_v8 = vld [vmem:[%s2132_s1 + $0x38] ss:$0 sps:$4 sm:$0x77]   ;;  %v1542_v11 = vld [vmem:[%s2132_s1 + $0x30] sm:$0xff]  }
   0x4   :  { %1377 = vmatprep.subr.bf16.mxu0 %v1537_v1  ;;  %1520 = vmatprep.subr.bf16.mxu1 %v1537_v1  ;;  %v1552_v7 = vld [vmem:[%s2133_s0 + $0x40] sm:$0xff]   ;;  %v262_v13 = vand.u32 %v1543_v8, %v260_v12  ;;  %v1545_v14 = vld [vmem:[%s2133_s0 + $0x8] sm:$0xff]   ;;  %v1546_v17 = vld [vmem:[%s2133_s0 + $0x10] sm:$0xff]  }
   0x5   :  { %1391 = vmatprep.mubr.msk.bf16.mxu0 %vm208_vm0, %v1544_v4  ;;  %1407 = vmatprep.mubr.msk.bf16.mxu1 %vm208_vm0, %v1552_v7  ;;  %v1560_v15 = vld [vmem:[%s2134_s3] sm:$0xff]   ;;  %v1553_v16 = vld [vmem:[%s2133_s0 + $0x48] sm:$0xff]   ;;  %v1554_v18 = vld [vmem:[%s2133_s0 + $0x50] sm:$0xff]  }
   0x6   :  { %v1561_v19 = vld [vmem:[%s2134_s3 + $0x8] sm:$0xff]   ;;  %v1562_v20 = vld [vmem:[%s2134_s3 + $0x10] sm:$0xff]   ;;  %v1547_v21 = vld [vmem:[%s2133_s0 + $0x18] sm:$0xff]  }
   0x7   :  { %1378 = vmatpush3.bf16.msra.mxu0 %v1537_v1  ;;  %1528 = vmatpush3.bf16.msra.mxu1 %v1537_v1  ;;  %v1555_v22 = vld [vmem:[%s2133_s0 + $0x58] sm:$0xff]   ;;  %v1548_v23 = vld [vmem:[%s2133_s0 + $0x20] sm:$0xff]   ;;  %v1549_v27 = vld [vmem:[%s2133_s0 + $0x28] sm:$0xff]  }
   0x8   :  { %1379 = vmatprep.subr.bf16.mxu0 %v1538_v2  ;;  %1521 = vmatprep.subr.bf16.mxu1 %v1538_v2  ;;  %v1556_v24 = vld [vmem:[%s2133_s0 + $0x60] sm:$0xff]   ;;  %v1563_v25 = vld [vmem:[%s2134_s3 + $0x18] sm:$0xff]   ;;  %v1557_v28 = vld [vmem:[%s2133_s0 + $0x68] sm:$0xff]  }
   0x9   :  { %v1564_v26 = vld [vmem:[%s2134_s3 + $0x20] sm:$0xff]   ;;  %v1550_v29 = vld [vmem:[%s2133_s0 + $0x30] sm:$0xff]   ;;  %v1565_v31 = vld [vmem:[%s2134_s3 + $0x28] sm:$0xff]  }
   0xa   :  { %v1558_v30 = vld [vmem:[%s2133_s0 + $0x70] sm:$0xff]   ;;  %v1551_v32 = vld [vmem:[%s2133_s0 + $0x38] sm:$0xff]   ;;  %v1568_v36 = vld [vmem:[%s2135_s5] sm:$0xff]  }
   0xb   :  { %1380 = vmatpush3.bf16.msra.mxu0 %v1538_v2  ;;  %1529 = vmatpush3.bf16.msra.mxu1 %v1538_v2  ;;  %v1559_v33 = vld [vmem:[%s2133_s0 + $0x78] sm:$0xff]   ;;  %v1566_v34 = vld [vmem:[%s2134_s3 + $0x30] sm:$0xff]   ;;  %v1569_v37 = vld [vmem:[%s2135_s5 + $0x8] sm:$0xff]  }
   0xc   :  { %1381 = vmatprep.subr.bf16.mxu0 %v1539_v3  ;;  %1522 = vmatprep.subr.bf16.mxu1 %v1539_v3  ;;  %v1567_v35 = vld [vmem:[%s2134_s3 + $0x38] sm:$0xff]   ;;  %v1570_v38 = vld [vmem:[%s2135_s5 + $0x10] sm:$0xff]   ;;  %v1572_v40 = vld [vmem:[%s2135_s5 + $0x20] sm:$0xff]  }
   0xd   :  { %v1571_v39 = vld [vmem:[%s2135_s5 + $0x18] sm:$0xff]   ;;  %v1573_v41 = vld [vmem:[%s2135_s5 + $0x28] sm:$0xff]   ;;  %v1878_v42 = vld [vmem:[%s2136_s2] ss:$0 sm:$0xff] }
   0xf   :  { %1382 = vmatpush3.bf16.msra.mxu0 %v1539_v3  ;;  %1530 = vmatpush3.bf16.msra.mxu1 %v1539_v3 }
  0x10   :  { %1383 = vmatprep.subr.bf16.mxu0 %v1540_v5  ;;  %1523 = vmatprep.subr.bf16.mxu1 %v1540_v5 }
  0x13   :  { %1384 = vmatpush3.bf16.msra.mxu0 %v1540_v5  ;;  %1531 = vmatpush3.bf16.msra.mxu1 %v1540_v5 }
  0x14   :  { %1385 = vmatprep.subr.bf16.mxu0 %v1541_v6  ;;  %1524 = vmatprep.subr.bf16.mxu1 %v1541_v6 }
  0x17   :  { %1386 = vmatpush3.bf16.msra.mxu0 %v1541_v6  ;;  %1532 = vmatpush3.bf16.msra.mxu1 %v1541_v6 }
  0x18   :  { %1387 = vmatprep.subr.bf16.mxu0 %v1542_v11  ;;  %1525 = vmatprep.subr.bf16.mxu1 %v1542_v11 }
  0x1b   :  { %1388 = vmatpush3.bf16.msra.mxu0 %v1542_v11  ;;  %1533 = vmatpush3.bf16.msra.mxu1 %v1542_v11 }
  0x1c   :  { %1389 = vmatprep.subr.bf16.mxu0 %v262_v13  ;;  %1526 = vmatprep.subr.bf16.mxu1 %v262_v13 }
  0x1f   :  { %1390 = vmatpush3.bf16.msra.mxu0 %v262_v13  ;;  %1534 = vmatpush3.bf16.msra.mxu1 %v262_v13 }
  0x20   :  { %1423 = vmatprep.subr.bf16.mxu1 %v1560_v15  ;;  %1471 = vmatprep.subr.bf16.mxu0 %v1568_v36 }
  0x22   :  { %1392 = vmatmul.mubr.msk.bf16.vlgmr.msra.gmra.mrb[0].mxu0 %vm208_vm0, %v1545_v14  ;;  %1408 = vmatmul.mubr.msk.bf16.vlgmr.msra.gmra.mrb[0].mxu1 %vm208_vm0, %v1553_v16 }
  0x23   :  { %1395 = vmatprep.mubr.msk.bf16.mxu0 %vm208_vm0, %v1546_v17  ;;  %1411 = vmatprep.mubr.msk.bf16.mxu1 %vm208_vm0, %v1554_v18 }
  0x24   :  { %1424 = vmatpush3.bf16.msra.mxu1 %v1560_v15  ;;  %1472 = vmatpush3.bf16.msra.mxu0 %v1568_v36 }
  0x25   :  { %1425 = vmatprep.subr.bf16.mxu1 %v1561_v19  ;;  %1473 = vmatprep.subr.bf16.mxu0 %v1569_v37 }
  0x28   :  { %1426 = vmatpush3.bf16.msra.mxu1 %v1561_v19  ;;  %1474 = vmatpush3.bf16.msra.mxu0 %v1569_v37 }
  0x29   :  { %1427 = vmatprep.subr.bf16.mxu1 %v1562_v20  ;;  %1475 = vmatprep.subr.bf16.mxu0 %v1570_v38 }
  0x2a   :  { %1396 = vmatmul.mubr.msk.bf16.gmra.mrb[4].mxu0 %vm208_vm0, %v1547_v21  ;;  %1412 = vmatmul.mubr.msk.bf16.gmra.mrb[4].mxu1 %vm208_vm0, %v1555_v22 }
  0x2b   :  { %1399 = vmatprep.mubr.msk.bf16.mxu0 %vm208_vm0, %v1548_v23  ;;  %1415 = vmatprep.mubr.msk.bf16.mxu1 %vm208_vm0, %v1556_v24 }
  0x2c   :  { %1428 = vmatpush3.bf16.msra.mxu1 %v1562_v20  ;;  %1476 = vmatpush3.bf16.msra.mxu0 %v1570_v38 }
  0x2d   :  { %1429 = vmatprep.subr.bf16.mxu1 %v1563_v25  ;;  %1477 = vmatprep.subr.bf16.mxu0 %v1571_v39 }
  0x30   :  { %1430 = vmatpush3.bf16.msra.mxu1 %v1563_v25  ;;  %1478 = vmatpush3.bf16.msra.mxu0 %v1571_v39 }
  0x31   :  { %1431 = vmatprep.subr.bf16.mxu1 %v1564_v26  ;;  %1479 = vmatprep.subr.bf16.mxu0 %v1572_v40 }
  0x32   :  { %1400 = vmatmul.mubr.msk.bf16.gmra.mrb[8].mxu0 %vm208_vm0, %v1549_v27  ;;  %1416 = vmatmul.mubr.msk.bf16.gmra.mrb[8].mxu1 %vm208_vm0, %v1557_v28 }
  0x33   :  { %1403 = vmatprep.mubr.msk.bf16.mxu0 %vm208_vm0, %v1550_v29  ;;  %1419 = vmatprep.mubr.msk.bf16.mxu1 %vm208_vm0, %v1558_v30 }
  0x34   :  { %1432 = vmatpush3.bf16.msra.mxu1 %v1564_v26  ;;  %1480 = vmatpush3.bf16.msra.mxu0 %v1572_v40 }
  0x35   :  { %1433 = vmatprep.subr.bf16.mxu1 %v1565_v31  ;;  %1481 = vmatprep.subr.bf16.mxu0 %v1573_v41 }
  0x38   :  { %1434 = vmatpush3.bf16.msra.mxu1 %v1565_v31  ;;  %1482 = vmatpush3.bf16.msra.mxu0 %v1573_v41 }
  0x39   :  { %1435 = vmatprep.subr.bf16.mxu1 %v1566_v34 }
  0x3a   :  { %1404 = vmatmul.mubr.msk.bf16.gmra.mrb[12].mxu0 %vm208_vm0, %v1551_v32  ;;  %1420 = vmatmul.mubr.msk.bf16.gmra.mrb[12].mxu1 %vm208_vm0, %v1559_v33 }
  0x3c   :  { %1436 = vmatpush3.bf16.msra.mxu1 %v1566_v34 }
  0x3d   :  { %1437 = vmatprep.subr.bf16.mxu1 %v1567_v35 }
  0x40   :  { %1438 = vmatpush3.bf16.msra.mxu1 %v1567_v35 }
  0xf5   :  { %v1393_v43 = vpop.f32.mrb[0].mxu0  ;;  %v1409_v44 = vpop.f32.mrb[0].mxu1 }
  0xf6   :  { %v307_v45 = vadd.f32 %v1393_v43, %v1878_v42  ;;  %v298_v46 = vpop.f32.mrb[1].mxu0  ;;  %v371_v47 = vadd.f32 %v1409_v44, %v1878_v42  ;;  %v362_v48 = vpop.f32.mrb[1].mxu1 }
  0xf7   :  { %v299_v49 = vadd.f32 %v1878_v42, %v298_v46  ;;  %v1394_v50 = vpop.f32.mrb[2].mxu0  ;;  %v363_v51 = vadd.f32 %v1878_v42, %v362_v48  ;;  %v1410_v52 = vpop.f32.mrb[2].mxu1 }
  0xf8   :  { %v310_v53 = vadd.f32 %v1394_v50, %v1878_v42  ;;  %v301_v54 = vpop.f32.mrb[3].mxu0  ;;  %v443_v55 = vmax.f32 %v371_v47, 0.0  ;;  %v374_v56 = vadd.f32 %v1410_v52, %v1878_v42  ;;  %v365_v57 = vpop.f32.mrb[3].mxu1  ;;  %v427_v61 = vmax.f32 %v307_v45, 0.0 }
  0xf9   :  { %v302_v58 = vadd.f32 %v1878_v42, %v301_v54  ;;  %v441_v59 = vmax.f32 %v363_v51, 0.0  ;;  %v366_v60 = vadd.f32 %v1878_v42, %v365_v57  ;;  %v425_v0 = vmax.f32 %v299_v49, 0.0 }
  0xfa   :  { %v428_v62 = vmax.f32 %v310_v53, 0.0  ;;  %v444_v63 = vmax.f32 %v374_v56, 0.0 }
  0xfb   :  { %v426_v1 = vmax.f32 %v302_v58, 0.0  ;;  %v442_v2 = vmax.f32 %v366_v60, 0.0 }
  0xfc   :  { %v458_v3 = vpack.c.bf16 %v428_v62, %v427_v61  ;;  %v1888_v4 = vpack.c.bf16 %v444_v63, %v443_v55 }
  0xfd   :  { %v457_v5 = vpack.c.bf16 %v426_v1, %v425_v0  ;;  %v1397_v6 = vpop.f32.mrb[4].mxu0  ;;  %v1890_v7 = vpack.c.bf16 %v442_v2, %v441_v59  ;;  %v1413_v8 = vpop.f32.mrb[4].mxu1 }
  0xfe   :  { %v323_v9 = vadd.f32 %v1397_v6, %v1878_v42  ;;  %v314_v10 = vpop.f32.mrb[5].mxu0  ;;  %v387_v11 = vadd.f32 %v1413_v8, %v1878_v42  ;;  %v378_v12 = vpop.f32.mrb[5].mxu1 }
  0xff   :  { %v315_v13 = vadd.f32 %v1878_v42, %v314_v10  ;;  %v1398_v14 = vpop.f32.mrb[6].mxu0  ;;  %1439 = vmatprep.mubr.bf16.mxu1 %v457_v5  ;;  %v379_v15 = vadd.f32 %v1878_v42, %v378_v12  ;;  %v1414_v16 = vpop.f32.mrb[6].mxu1 }
 0x100   :  { %v326_v17 = vadd.f32 %v1398_v14, %v1878_v42  ;;  %v317_v18 = vpop.f32.mrb[7].mxu0  ;;  %1440 = vmatmul.mubr.bf16.vlgmr.msra.gmra.mrb[16].mxu1 %v458_v3  ;;  %v447_v19 = vmax.f32 %v387_v11, 0.0  ;;  %v390_v20 = vadd.f32 %v1414_v16, %v1878_v42  ;;  %v381_v21 = vpop.f32.mrb[7].mxu1  ;;  %v431_v25 = vmax.f32 %v323_v9, 0.0 }
 0x101   :  { %v318_v22 = vadd.f32 %v1878_v42, %v317_v18  ;;  %v445_v23 = vmax.f32 %v379_v15, 0.0  ;;  %v382_v24 = vadd.f32 %v1878_v42, %v381_v21  ;;  %v429_v28 = vmax.f32 %v315_v13, 0.0 }
 0x102   :  { %v432_v26 = vmax.f32 %v326_v17, 0.0  ;;  %v448_v27 = vmax.f32 %v390_v20, 0.0 }
 0x103   :  { %v430_v29 = vmax.f32 %v318_v22, 0.0  ;;  %v446_v30 = vmax.f32 %v382_v24, 0.0 }
 0x104   :  { %v460_v31 = vpack.c.bf16 %v432_v26, %v431_v25  ;;  %v1900_v32 = vpack.c.bf16 %v448_v27, %v447_v19 }
 0x105   :  { %v459_v33 = vpack.c.bf16 %v430_v29, %v429_v28  ;;  %v1401_v34 = vpop.f32.mrb[8].mxu0  ;;  %v1902_v35 = vpack.c.bf16 %v446_v30, %v445_v23  ;;  %v1417_v36 = vpop.f32.mrb[8].mxu1 }
 0x106   :  { %v339_v37 = vadd.f32 %v1401_v34, %v1878_v42  ;;  %v330_v38 = vpop.f32.mrb[9].mxu0  ;;  %v403_v39 = vadd.f32 %v1417_v36, %v1878_v42  ;;  %v394_v40 = vpop.f32.mrb[9].mxu1 }
 0x107   :  { %v331_v41 = vadd.f32 %v1878_v42, %v330_v38  ;;  %v1402_v43 = vpop.f32.mrb[10].mxu0  ;;  %1443 = vmatprep.mubr.bf16.mxu1 %v459_v33  ;;  %v395_v44 = vadd.f32 %v1878_v42, %v394_v40  ;;  %v1418_v45 = vpop.f32.mrb[10].mxu1 }
 0x108   :  { %v342_v46 = vadd.f32 %v1402_v43, %v1878_v42  ;;  %v333_v47 = vpop.f32.mrb[11].mxu0  ;;  %1444 = vmatmul.mubr.bf16.gmra.mrb[20].mxu1 %v460_v31  ;;  %v451_v48 = vmax.f32 %v403_v39, 0.0  ;;  %v406_v49 = vadd.f32 %v1418_v45, %v1878_v42  ;;  %v397_v50 = vpop.f32.mrb[11].mxu1  ;;  %v435_v54 = vmax.f32 %v339_v37, 0.0 }
 0x109   :  { %v334_v51 = vadd.f32 %v1878_v42, %v333_v47  ;;  %v449_v52 = vmax.f32 %v395_v44, 0.0  ;;  %v398_v53 = vadd.f32 %v1878_v42, %v397_v50  ;;  %v433_v57 = vmax.f32 %v331_v41, 0.0 }
 0x10a   :  { %v436_v55 = vmax.f32 %v342_v46, 0.0  ;;  %v452_v56 = vmax.f32 %v406_v49, 0.0 }
 0x10b   :  { %v434_v58 = vmax.f32 %v334_v51, 0.0  ;;  %v450_v59 = vmax.f32 %v398_v53, 0.0 }
 0x10c   :  { %v462_v60 = vpack.c.bf16 %v436_v55, %v435_v54  ;;  %v470_v61 = vpack.c.bf16 %v452_v56, %v451_v48 }
 0x10d   :  { %v461_v62 = vpack.c.bf16 %v434_v58, %v433_v57  ;;  %v1405_v63 = vpop.f32.mrb[12].mxu0  ;;  %v469_v0 = vpack.c.bf16 %v450_v59, %v449_v52  ;;  %v1421_v1 = vpop.f32.mrb[12].mxu1 }
 0x10e   :  { %v355_v2 = vadd.f32 %v1405_v63, %v1878_v42  ;;  %v346_v3 = vpop.f32.mrb[13].mxu0  ;;  %v419_v5 = vadd.f32 %v1421_v1, %v1878_v42  ;;  %v410_v6 = vpop.f32.mrb[13].mxu1 }
 0x10f   :  { %v347_v8 = vadd.f32 %v1878_v42, %v346_v3  ;;  %v1406_v9 = vpop.f32.mrb[14].mxu0  ;;  %1447 = vmatprep.mubr.bf16.mxu1 %v461_v62  ;;  %v411_v10 = vadd.f32 %v1878_v42, %v410_v6  ;;  %v1422_v11 = vpop.f32.mrb[14].mxu1 }
 0x110   :  { %v358_v12 = vadd.f32 %v1406_v9, %v1878_v42  ;;  %v349_v13 = vpop.f32.mrb[15].mxu0  ;;  %1448 = vmatmul.mubr.bf16.gmra.mrb[24].mxu1 %v462_v60  ;;  %v455_v14 = vmax.f32 %v419_v5, 0.0  ;;  %v422_v15 = vadd.f32 %v1422_v11, %v1878_v42  ;;  %v413_v16 = vpop.f32.mrb[15].mxu1  ;;  %v439_v20 = vmax.f32 %v355_v2, 0.0 }
 0x111   :  { %v350_v17 = vadd.f32 %v1878_v42, %v349_v13  ;;  %v453_v18 = vmax.f32 %v411_v10, 0.0  ;;  %v414_v19 = vadd.f32 %v1878_v42, %v413_v16  ;;  %v437_v23 = vmax.f32 %v347_v8, 0.0  ;;  %v1574_v42 = vld [vmem:[%s2135_s5 + $0x30] sm:$0xff]  }
 0x112   :  { %v440_v21 = vmax.f32 %v358_v12, 0.0  ;;  %v456_v22 = vmax.f32 %v422_v15, 0.0  ;;  %1483 = vmatprep.subr.bf16.mxu0 %v1574_v42 }
 0x113   :  { %v438_v24 = vmax.f32 %v350_v17, 0.0  ;;  %v454_v25 = vmax.f32 %v414_v19, 0.0  ;;  %1484 = vmatpush3.bf16.msra.mxu0 %v1574_v42 }
 0x114   :  { %v464_v26 = vpack.c.bf16 %v440_v21, %v439_v20  ;;  %v472_v27 = vpack.c.bf16 %v456_v22, %v455_v14 }
 0x115   :  { %v463_v28 = vpack.c.bf16 %v438_v24, %v437_v23  ;;  %v471_v29 = vpack.c.bf16 %v454_v25, %v453_v18 }
 0x117   :  { %1451 = vmatprep.mubr.bf16.mxu1 %v463_v28 }
 0x118   :  { %1452 = vmatmul.mubr.bf16.gmra.mrb[28].mxu1 %v464_v26 }
 0x119   :  { %1455 = vmatprep.mubr.bf16.mxu1 %v1890_v7  ;;  %v1575_v7 = vld [vmem:[%s2135_s5 + $0x38] sm:$0xff]  }
 0x11a   :  { %1485 = vmatprep.subr.bf16.mxu0 %v1575_v7 }
 0x11b   :  { %1486 = vmatpush3.bf16.msra.mxu0 %v1575_v7 }
 0x120   :  { %1456 = vmatmul.mubr.bf16.gmra.mrb[32].mxu1 %v1888_v4  ;;  %v1933_v4 = vld [vmem:[%s2137_s4] ss:$0 sm:$0xff] }
 0x121   :  { %1459 = vmatprep.mubr.bf16.mxu1 %v1902_v35 }
 0x128   :  { %1460 = vmatmul.mubr.bf16.gmra.mrb[36].mxu1 %v1900_v32 }
 0x129   :  { %1463 = vmatprep.mubr.bf16.mxu1 %v469_v0 }
 0x130   :  { %1464 = vmatmul.mubr.bf16.gmra.mrb[40].mxu1 %v470_v61 }
 0x131   :  { %1467 = vmatprep.mubr.bf16.mxu1 %v471_v29 }
 0x138   :  { %1468 = vmatmul.mubr.bf16.gmra.mrb[44].mxu1 %v472_v27 }
 0x1d3   :  { %v1441_v30 = vpop.f32.mrb[16].mxu1 }
 0x1d4   :  { %v586_v31 = vadd.f32 %v1441_v30, %v1933_v4  ;;  %v577_v32 = vpop.f32.mrb[17].mxu1 }
 0x1d5   :  { %v578_v33 = vadd.f32 %v1933_v4, %v577_v32  ;;  %v1442_v34 = vpop.f32.mrb[18].mxu1 }
 0x1d6   :  { %v589_v35 = vadd.f32 %v1442_v34, %v1933_v4  ;;  %v580_v36 = vpop.f32.mrb[19].mxu1  ;;  %v706_v38 = vmax.f32 %v586_v31, 0.0 }
 0x1d7   :  { %v581_v37 = vadd.f32 %v1933_v4, %v580_v36  ;;  %v704_v40 = vmax.f32 %v578_v33, 0.0 }
 0x1d8   :  { %v707_v39 = vmax.f32 %v589_v35, 0.0 }
 0x1d9   :  { %v705_v41 = vmax.f32 %v581_v37, 0.0 }
 0x1da   :  { %v737_v43 = vpack.c.bf16 %v707_v39, %v706_v38 }
 0x1db   :  { %v736_v44 = vpack.c.bf16 %v705_v41, %v704_v40  ;;  %v1445_v45 = vpop.f32.mrb[20].mxu1 }
 0x1dc   :  { %v602_v46 = vadd.f32 %v1445_v45, %v1933_v4  ;;  %v593_v47 = vpop.f32.mrb[21].mxu1 }
 0x1dd   :  { %v594_v48 = vadd.f32 %v1933_v4, %v593_v47  ;;  %v1446_v49 = vpop.f32.mrb[22].mxu1  ;;  %1487 = vmatprep.mubr.bf16.mxu0 %v736_v44 }
 0x1de   :  { %v605_v50 = vadd.f32 %v1446_v49, %v1933_v4  ;;  %v596_v51 = vpop.f32.mrb[23].mxu1  ;;  %1488 = vmatmul.mubr.bf16.vlgmr.msra.gmra.mrb[16].mxu0 %v737_v43  ;;  %v710_v53 = vmax.f32 %v602_v46, 0.0 }
 0x1df   :  { %v597_v52 = vadd.f32 %v1933_v4, %v596_v51  ;;  %v708_v55 = vmax.f32 %v594_v48, 0.0 }
 0x1e0   :  { %v711_v54 = vmax.f32 %v605_v50, 0.0 }
 0x1e1   :  { %v709_v56 = vmax.f32 %v597_v52, 0.0 }
 0x1e2   :  { %v739_v57 = vpack.c.bf16 %v711_v54, %v710_v53 }
 0x1e3   :  { %v738_v58 = vpack.c.bf16 %v709_v56, %v708_v55  ;;  %v1449_v59 = vpop.f32.mrb[24].mxu1 }
 0x1e4   :  { %v618_v60 = vadd.f32 %v1449_v59, %v1933_v4  ;;  %v609_v61 = vpop.f32.mrb[25].mxu1 }
 0x1e5   :  { %v610_v62 = vadd.f32 %v1933_v4, %v609_v61  ;;  %v1450_v63 = vpop.f32.mrb[26].mxu1  ;;  %1491 = vmatprep.mubr.bf16.mxu0 %v738_v58 }
 0x1e6   :  { %v621_v0 = vadd.f32 %v1450_v63, %v1933_v4  ;;  %v612_v1 = vpop.f32.mrb[27].mxu1  ;;  %1492 = vmatmul.mubr.bf16.gmra.mrb[20].mxu0 %v739_v57  ;;  %v714_v3 = vmax.f32 %v618_v60, 0.0 }
 0x1e7   :  { %v613_v2 = vadd.f32 %v1933_v4, %v612_v1  ;;  %v712_v6 = vmax.f32 %v610_v62, 0.0 }
 0x1e8   :  { %v715_v5 = vmax.f32 %v621_v0, 0.0 }
 0x1e9   :  { %v713_v8 = vmax.f32 %v613_v2, 0.0 }
 0x1ea   :  { %v741_v9 = vpack.c.bf16 %v715_v5, %v714_v3 }
 0x1eb   :  { %v740_v10 = vpack.c.bf16 %v713_v8, %v712_v6  ;;  %v1453_v11 = vpop.f32.mrb[28].mxu1 }
 0x1ec   :  { %v634_v12 = vadd.f32 %v1453_v11, %v1933_v4  ;;  %v625_v13 = vpop.f32.mrb[29].mxu1 }
 0x1ed   :  { %v626_v14 = vadd.f32 %v1933_v4, %v625_v13  ;;  %v1454_v15 = vpop.f32.mrb[30].mxu1  ;;  %1495 = vmatprep.mubr.bf16.mxu0 %v740_v10 }
 0x1ee   :  { %v637_v16 = vadd.f32 %v1454_v15, %v1933_v4  ;;  %v628_v17 = vpop.f32.mrb[31].mxu1  ;;  %1496 = vmatmul.mubr.bf16.gmra.mrb[24].mxu0 %v741_v9  ;;  %v718_v19 = vmax.f32 %v634_v12, 0.0 }
 0x1ef   :  { %v629_v18 = vadd.f32 %v1933_v4, %v628_v17  ;;  %v716_v21 = vmax.f32 %v626_v14, 0.0 }
 0x1f0   :  { %v719_v20 = vmax.f32 %v637_v16, 0.0 }
 0x1f1   :  { %v717_v22 = vmax.f32 %v629_v18, 0.0  ;;  %v1970_v18 = vld [vmem:[%s2138_s6] ss:$0 sm:$0xff] }
 0x1f2   :  { %v743_v23 = vpack.c.bf16 %v719_v20, %v718_v19 }
 0x1f3   :  { %v742_v24 = vpack.c.bf16 %v717_v22, %v716_v21  ;;  %v1457_v25 = vpop.f32.mrb[32].mxu1 }
 0x1f4   :  { %v650_v26 = vadd.f32 %v1457_v25, %v1933_v4  ;;  %v641_v27 = vpop.f32.mrb[33].mxu1 }
 0x1f5   :  { %v642_v28 = vadd.f32 %v1933_v4, %v641_v27  ;;  %v1458_v29 = vpop.f32.mrb[34].mxu1  ;;  %1499 = vmatprep.mubr.bf16.mxu0 %v742_v24 }
 0x1f6   :  { %v653_v42 = vadd.f32 %v1458_v29, %v1933_v4  ;;  %v644_v7 = vpop.f32.mrb[35].mxu1  ;;  %1500 = vmatmul.mubr.bf16.gmra.mrb[28].mxu0 %v743_v23  ;;  %v722_v31 = vmax.f32 %v650_v26, 0.0 }
 0x1f7   :  { %v645_v30 = vadd.f32 %v1933_v4, %v644_v7  ;;  %v720_v33 = vmax.f32 %v642_v28, 0.0 }
 0x1f8   :  { %v723_v32 = vmax.f32 %v653_v42, 0.0 }
 0x1f9   :  { %v721_v34 = vmax.f32 %v645_v30, 0.0 }
 0x1fa   :  { %v745_v35 = vpack.c.bf16 %v723_v32, %v722_v31 }
 0x1fb   :  { %v744_v36 = vpack.c.bf16 %v721_v34, %v720_v33  ;;  %v1461_v37 = vpop.f32.mrb[36].mxu1 }
 0x1fc   :  { %v666_v38 = vadd.f32 %v1461_v37, %v1933_v4  ;;  %v657_v39 = vpop.f32.mrb[37].mxu1 }
 0x1fd   :  { %v658_v40 = vadd.f32 %v1933_v4, %v657_v39  ;;  %v1462_v41 = vpop.f32.mrb[38].mxu1  ;;  %1503 = vmatprep.mubr.bf16.mxu0 %v744_v36 }
 0x1fe   :  { %v669_v43 = vadd.f32 %v1462_v41, %v1933_v4  ;;  %v660_v44 = vpop.f32.mrb[39].mxu1  ;;  %1504 = vmatmul.mubr.bf16.gmra.mrb[32].mxu0 %v745_v35  ;;  %v726_v46 = vmax.f32 %v666_v38, 0.0 }
 0x1ff   :  { %v661_v45 = vadd.f32 %v1933_v4, %v660_v44  ;;  %v724_v48 = vmax.f32 %v658_v40, 0.0 }
 0x200   :  { %v727_v47 = vmax.f32 %v669_v43, 0.0 }
 0x201   :  { %v725_v49 = vmax.f32 %v661_v45, 0.0 }
 0x202   :  { %v747_v50 = vpack.c.bf16 %v727_v47, %v726_v46 }
 0x203   :  { %v746_v51 = vpack.c.bf16 %v725_v49, %v724_v48  ;;  %v1465_v52 = vpop.f32.mrb[40].mxu1 }
 0x204   :  { %v682_v53 = vadd.f32 %v1465_v52, %v1933_v4  ;;  %v673_v54 = vpop.f32.mrb[41].mxu1 }
 0x205   :  { %v674_v55 = vadd.f32 %v1933_v4, %v673_v54  ;;  %v1466_v56 = vpop.f32.mrb[42].mxu1  ;;  %1507 = vmatprep.mubr.bf16.mxu0 %v746_v51 }
 0x206   :  { %v685_v57 = vadd.f32 %v1466_v56, %v1933_v4  ;;  %v676_v58 = vpop.f32.mrb[43].mxu1  ;;  %1508 = vmatmul.mubr.bf16.gmra.mrb[36].mxu0 %v747_v50  ;;  %v730_v60 = vmax.f32 %v682_v53, 0.0 }
 0x207   :  { %v677_v59 = vadd.f32 %v1933_v4, %v676_v58  ;;  %v728_v62 = vmax.f32 %v674_v55, 0.0 }
 0x208   :  { %v731_v61 = vmax.f32 %v685_v57, 0.0 }
 0x209   :  { %v729_v63 = vmax.f32 %v677_v59, 0.0 }
 0x20a   :  { %v749_v0 = vpack.c.bf16 %v731_v61, %v730_v60 }
 0x20b   :  { %v748_v1 = vpack.c.bf16 %v729_v63, %v728_v62  ;;  %v1469_v2 = vpop.f32.mrb[44].mxu1 }
 0x20c   :  { %v698_v3 = vadd.f32 %v1469_v2, %v1933_v4  ;;  %v689_v5 = vpop.f32.mrb[45].mxu1 }
 0x20d   :  { %v690_v6 = vadd.f32 %v1933_v4, %v689_v5  ;;  %v1470_v8 = vpop.f32.mrb[46].mxu1  ;;  %1511 = vmatprep.mubr.bf16.mxu0 %v748_v1 }
 0x20e   :  { %v701_v9 = vadd.f32 %v1470_v8, %v1933_v4  ;;  %v692_v10 = vpop.f32.mrb[47].mxu1  ;;  %1512 = vmatmul.mubr.bf16.gmra.mrb[40].mxu0 %v749_v0  ;;  %v734_v12 = vmax.f32 %v698_v3, 0.0 }
 0x20f   :  { %v693_v11 = vadd.f32 %v1933_v4, %v692_v10  ;;  %v732_v14 = vmax.f32 %v690_v6, 0.0 }
 0x210   :  { %v735_v13 = vmax.f32 %v701_v9, 0.0 }
 0x211   :  { %v733_v15 = vmax.f32 %v693_v11, 0.0 }
 0x212   :  { %v751_v16 = vpack.c.bf16 %v735_v13, %v734_v12 }
 0x213   :  { %v750_v17 = vpack.c.bf16 %v733_v15, %v732_v14 }
 0x215   :  { %1515 = vmatprep.mubr.bf16.mxu0 %v750_v17 }
 0x216   :  { %1516 = vmatmul.mubr.bf16.gmra.mrb[44].mxu0 %v751_v16 }
 0x2b1   :  { %v1489_v19 = vpop.f32.mrb[16].mxu0 }
 0x2b2   :  { %v865_v20 = vadd.f32 %v1489_v19, %v1970_v18  ;;  %v856_v21 = vpop.f32.mrb[17].mxu0 }
 0x2b3   :  { %v857_v22 = vadd.f32 %v1970_v18, %v856_v21  ;;  %v1490_v4 = vpop.f32.mrb[18].mxu0 }
 0x2b4   :  { %v1273_v23 = vmul.f32 -1.442695, %v865_v20  ;;  %v868_v24 = vadd.f32 %v1490_v4, %v1970_v18  ;;  %v859_v25 = vpop.f32.mrb[19].mxu0 }
 0x2b5   :  { %v1271_v26 = vmul.f32 -1.442695, %v857_v22  ;;  %v860_v27 = vadd.f32 %v1970_v18, %v859_v25 }
 0x2b6   :  { %1576 = vpow2.f32 %v1273_v23  ;;  %v1274_v28 = vmul.f32 -1.442695, %v868_v24 }
 0x2b7   :  { %1578 = vpow2.f32 %v1271_v26  ;;  %v1272_v29 = vmul.f32 -1.442695, %v860_v27 }
 0x2b8   :  { %1580 = vpow2.f32 %v1274_v28 }
 0x2b9   :  { %1582 = vpow2.f32 %v1272_v29  ;;  %v1493_v42 = vpop.f32.mrb[20].mxu0 }
 0x2ba   :  { %v881_v7 = vadd.f32 %v1493_v42, %v1970_v18  ;;  %v872_v30 = vpop.f32.mrb[21].mxu0 }
 0x2bb   :  { %v873_v31 = vadd.f32 %v1970_v18, %v872_v30  ;;  %v1494_v32 = vpop.f32.mrb[22].mxu0 }
 0x2bc   :  { %v1277_v33 = vmul.f32 -1.442695, %v881_v7  ;;  %v884_v34 = vadd.f32 %v1494_v32, %v1970_v18  ;;  %v875_v35 = vpop.f32.mrb[23].mxu0 }
 0x2bd   :  { %v1275_v36 = vmul.f32 -1.442695, %v873_v31  ;;  %v876_v37 = vadd.f32 %v1970_v18, %v875_v35 }
 0x2be   :  { %1584 = vpow2.f32 %v1277_v33  ;;  %v1278_v38 = vmul.f32 -1.442695, %v884_v34 }
 0x2bf   :  { %1586 = vpow2.f32 %v1275_v36  ;;  %v1276_v39 = vmul.f32 -1.442695, %v876_v37 }
 0x2c0   :  { %v1577_v40 = vpop.eup %1576  ;;  %1588 = vpow2.f32 %v1278_v38 }
 0x2c1   :  { %v1579_v41 = vpop.eup %1578  ;;  %v1081_v43 = vadd.f32 1.0, %v1577_v40  ;;  %1590 = vpow2.f32 %v1276_v39  ;;  %v1497_v44 = vpop.f32.mrb[24].mxu0 }
 0x2c2   :  { %v1581_v45 = vpop.eup %1580  ;;  %v1079_v46 = vadd.f32 1.0, %v1579_v41  ;;  %v897_v47 = vadd.f32 %v1497_v44, %v1970_v18  ;;  %v888_v48 = vpop.f32.mrb[25].mxu0 }
 0x2c3   :  { %v1583_v49 = vpop.eup %1582  ;;  %1592 = vrcp.f32 %v1081_v43  ;;  %v1082_v50 = vadd.f32 1.0, %v1581_v45  ;;  %v889_v51 = vadd.f32 %v1970_v18, %v888_v48  ;;  %v1498_v52 = vpop.f32.mrb[26].mxu0 }
 0x2c4   :  { %1594 = vrcp.f32 %v1079_v46  ;;  %v1080_v53 = vadd.f32 1.0, %v1583_v49  ;;  %v1281_v54 = vmul.f32 -1.442695, %v897_v47  ;;  %v900_v55 = vadd.f32 %v1498_v52, %v1970_v18  ;;  %v891_v56 = vpop.f32.mrb[27].mxu0 }
 0x2c5   :  { %1596 = vrcp.f32 %v1082_v50  ;;  %v1279_v57 = vmul.f32 -1.442695, %v889_v51  ;;  %v892_v58 = vadd.f32 %v1970_v18, %v891_v56 }
 0x2c6   :  { %1598 = vrcp.f32 %v1080_v53  ;;  %v1282_v59 = vmul.f32 -1.442695, %v900_v55 }
 0x2c7   :  { %1600 = vpow2.f32 %v1281_v54  ;;  %v1280_v60 = vmul.f32 -1.442695, %v892_v58 }
 0x2c8   :  { %v1585_v61 = vpop.eup %1584  ;;  %1602 = vpow2.f32 %v1279_v57 }
 0x2c9   :  { %v1587_v62 = vpop.eup %1586  ;;  %v1085_v63 = vadd.f32 1.0, %v1585_v61  ;;  %1604 = vpow2.f32 %v1282_v59  ;;  %v1501_v0 = vpop.f32.mrb[28].mxu0 }
 0x2ca   :  { %v1589_v1 = vpop.eup %1588  ;;  %v1083_v2 = vadd.f32 1.0, %v1587_v62  ;;  %1606 = vpow2.f32 %v1280_v60  ;;  %v913_v3 = vadd.f32 %v1501_v0, %v1970_v18  ;;  %v904_v5 = vpop.f32.mrb[29].mxu0 }
 0x2cb   :  { %v1591_v6 = vpop.eup %1590  ;;  %1608 = vrcp.f32 %v1085_v63  ;;  %v1086_v8 = vadd.f32 1.0, %v1589_v1  ;;  %v905_v9 = vadd.f32 %v1970_v18, %v904_v5  ;;  %v1502_v10 = vpop.f32.mrb[30].mxu0 }
 0x2cc   :  { %1610 = vrcp.f32 %v1083_v2  ;;  %v1084_v11 = vadd.f32 1.0, %v1591_v6  ;;  %v1285_v12 = vmul.f32 -1.442695, %v913_v3  ;;  %v916_v13 = vadd.f32 %v1502_v10, %v1970_v18  ;;  %v907_v14 = vpop.f32.mrb[31].mxu0 }
 0x2cd   :  { %v1593_v15 = vpop.eup %1592  ;;  %1612 = vrcp.f32 %v1086_v8  ;;  %v1283_v16 = vmul.f32 -1.442695, %v905_v9  ;;  %v908_v17 = vadd.f32 %v1970_v18, %v907_v14 }
 0x2ce   :  { %v1595_v19 = vpop.eup %1594  ;;  %1178 = vst.msk [vmem:[%s2139_s7 + $0x10] sm:$0xff] %vm1175_vm3, %v1593_v15  ;;  %1614 = vrcp.f32 %v1084_v11  ;;  %v1286_v20 = vmul.f32 -1.442695, %v916_v13 }
 0x2cf   :  { %v1597_v21 = vpop.eup %1596  ;;  %1176 = vst.msk [vmem:[%s2139_s7] sm:$0xff] %vm1175_vm3, %v1595_v19  ;;  %1616 = vpow2.f32 %v1285_v12  ;;  %v1284_v22 = vmul.f32 -1.442695, %v908_v17 }
 0x2d0   :  { %v1599_v4 = vpop.eup %1598  ;;  %1179 = vst.msk [vmem:[%s2139_s7 + $0x18] sm:$0xff] %vm1175_vm3, %v1597_v21  ;;  %1618 = vpow2.f32 %v1283_v16 }
 0x2d1   :  { %v1601_v23 = vpop.eup %1600  ;;  %1177 = vst.msk [vmem:[%s2139_s7 + $0x8] sm:$0xff] %vm1175_vm3, %v1599_v4  ;;  %1620 = vpow2.f32 %v1286_v20  ;;  %v1505_v24 = vpop.f32.mrb[32].mxu0 }
 0x2d2   :  { %v1603_v25 = vpop.eup %1602  ;;  %v1089_v26 = vadd.f32 1.0, %v1601_v23  ;;  %1622 = vpow2.f32 %v1284_v22  ;;  %v929_v27 = vadd.f32 %v1505_v24, %v1970_v18  ;;  %v920_v28 = vpop.f32.mrb[33].mxu0 }
 0x2d3   :  { %v1605_v29 = vpop.eup %1604  ;;  %v1087_v42 = vadd.f32 1.0, %v1603_v25  ;;  %v921_v7 = vadd.f32 %v1970_v18, %v920_v28  ;;  %v1506_v30 = vpop.f32.mrb[34].mxu0 }
 0x2d4   :  { %v1607_v31 = vpop.eup %1606  ;;  %1624 = vrcp.f32 %v1089_v26  ;;  %v1090_v32 = vadd.f32 1.0, %v1605_v29  ;;  %v1289_v33 = vmul.f32 -1.442695, %v929_v27  ;;  %v932_v34 = vadd.f32 %v1506_v30, %v1970_v18  ;;  %v923_v35 = vpop.f32.mrb[35].mxu0 }
 0x2d5   :  { %v1609_v36 = vpop.eup %1608  ;;  %1626 = vrcp.f32 %v1087_v42  ;;  %v1088_v37 = vadd.f32 1.0, %v1607_v31  ;;  %v1287_v38 = vmul.f32 -1.442695, %v921_v7  ;;  %v924_v39 = vadd.f32 %v1970_v18, %v923_v35 }
 0x2d6   :  { %v1611_v40 = vpop.eup %1610  ;;  %1182 = vst.msk [vmem:[%s2139_s7 + $0x30] sm:$0xff] %vm1175_vm3, %v1609_v36  ;;  %1628 = vrcp.f32 %v1090_v32  ;;  %v1290_v41 = vmul.f32 -1.442695, %v932_v34 }
 0x2d7   :  { %v1613_v43 = vpop.eup %1612  ;;  %1180 = vst.msk [vmem:[%s2139_s7 + $0x20] sm:$0xff] %vm1175_vm3, %v1611_v40  ;;  %1630 = vrcp.f32 %v1088_v37  ;;  %v1288_v44 = vmul.f32 -1.442695, %v924_v39 }
 0x2d8   :  { %v1615_v45 = vpop.eup %1614  ;;  %1183 = vst.msk [vmem:[%s2139_s7 + $0x38] sm:$0xff] %vm1175_vm3, %v1613_v43  ;;  %1632 = vpow2.f32 %v1289_v33 }
 0x2d9   :  { %v1617_v46 = vpop.eup %1616  ;;  %1181 = vst.msk [vmem:[%s2139_s7 + $0x28] sm:$0xff] %vm1175_vm3, %v1615_v45  ;;  %1634 = vpow2.f32 %v1287_v38  ;;  %v1509_v47 = vpop.f32.mrb[36].mxu0 }
 0x2da   :  { %v1619_v48 = vpop.eup %1618  ;;  %v1093_v49 = vadd.f32 1.0, %v1617_v46  ;;  %1636 = vpow2.f32 %v1290_v41  ;;  %v945_v50 = vadd.f32 %v1509_v47, %v1970_v18  ;;  %v936_v51 = vpop.f32.mrb[37].mxu0 }
 0x2db   :  { %v1621_v52 = vpop.eup %1620  ;;  %v1091_v53 = vadd.f32 1.0, %v1619_v48  ;;  %1638 = vpow2.f32 %v1288_v44  ;;  %v937_v54 = vadd.f32 %v1970_v18, %v936_v51  ;;  %v1510_v55 = vpop.f32.mrb[38].mxu0 }
 0x2dc   :  { %v1623_v56 = vpop.eup %1622  ;;  %1640 = vrcp.f32 %v1093_v49  ;;  %v1094_v57 = vadd.f32 1.0, %v1621_v52  ;;  %v1293_v58 = vmul.f32 -1.442695, %v945_v50  ;;  %v948_v59 = vadd.f32 %v1510_v55, %v1970_v18  ;;  %v939_v60 = vpop.f32.mrb[39].mxu0 }
 0x2dd   :  { %1642 = vrcp.f32 %v1091_v53  ;;  %v1092_v61 = vadd.f32 1.0, %v1623_v56  ;;  %v1291_v62 = vmul.f32 -1.442695, %v937_v54  ;;  %v940_v63 = vadd.f32 %v1970_v18, %v939_v60 }
 0x2de   :  { %v1625_v0 = vpop.eup %1624  ;;  %1644 = vrcp.f32 %v1094_v57  ;;  %v1294_v1 = vmul.f32 -1.442695, %v948_v59 }
 0x2df   :  { %v1627_v2 = vpop.eup %1626  ;;  %1186 = vst.msk [vmem:[%s2139_s7 + $0x50] sm:$0xff] %vm1175_vm3, %v1625_v0  ;;  %1646 = vrcp.f32 %v1092_v61  ;;  %v1292_v3 = vmul.f32 -1.442695, %v940_v63 }
 0x2e0   :  { %v1629_v5 = vpop.eup %1628  ;;  %1184 = vst.msk [vmem:[%s2139_s7 + $0x40] sm:$0xff] %vm1175_vm3, %v1627_v2  ;;  %1648 = vpow2.f32 %v1293_v58 }
 0x2e1   :  { %v1631_v6 = vpop.eup %1630  ;;  %1187 = vst.msk [vmem:[%s2139_s7 + $0x58] sm:$0xff] %vm1175_vm3, %v1629_v5  ;;  %1650 = vpow2.f32 %v1291_v62  ;;  %v1513_v8 = vpop.f32.mrb[40].mxu0 }
 0x2e2   :  { %v1633_v9 = vpop.eup %1632  ;;  %1185 = vst.msk [vmem:[%s2139_s7 + $0x48] sm:$0xff] %vm1175_vm3, %v1631_v6  ;;  %1652 = vpow2.f32 %v1294_v1  ;;  %v961_v10 = vadd.f32 %v1513_v8, %v1970_v18  ;;  %v952_v11 = vpop.f32.mrb[41].mxu0 }
 0x2e3   :  { %v1635_v12 = vpop.eup %1634  ;;  %v1097_v13 = vadd.f32 1.0, %v1633_v9  ;;  %1654 = vpow2.f32 %v1292_v3  ;;  %v953_v14 = vadd.f32 %v1970_v18, %v952_v11  ;;  %v1514_v15 = vpop.f32.mrb[42].mxu0 }
 0x2e4   :  { %v1637_v16 = vpop.eup %1636  ;;  %v1095_v17 = vadd.f32 1.0, %v1635_v12  ;;  %v964_v19 = vadd.f32 %v1514_v15, %v1970_v18  ;;  %v955_v20 = vpop.f32.mrb[43].mxu0  ;;  %v1297_v4 = vmul.f32 -1.442695, %v961_v10 }
 0x2e5   :  { %v1639_v21 = vpop.eup %1638  ;;  %1656 = vrcp.f32 %v1097_v13  ;;  %v1098_v22 = vadd.f32 1.0, %v1637_v16  ;;  %v956_v23 = vadd.f32 %v1970_v18, %v955_v20  ;;  %v1295_v26 = vmul.f32 -1.442695, %v953_v14 }
 0x2e6   :  { %v1641_v24 = vpop.eup %1640  ;;  %1658 = vrcp.f32 %v1095_v17  ;;  %v1096_v25 = vadd.f32 1.0, %v1639_v21  ;;  %v1298_v28 = vmul.f32 -1.442695, %v964_v19 }
 0x2e7   :  { %v1643_v27 = vpop.eup %1642  ;;  %1190 = vst.msk [vmem:[%s2139_s7 + $0x70] sm:$0xff] %vm1175_vm3, %v1641_v24  ;;  %1660 = vrcp.f32 %v1098_v22  ;;  %v1296_v42 = vmul.f32 -1.442695, %v956_v23 }
 0x2e8   :  { %v1645_v29 = vpop.eup %1644  ;;  %1188 = vst.msk [vmem:[%s2139_s7 + $0x60] sm:$0xff] %vm1175_vm3, %v1643_v27  ;;  %1662 = vrcp.f32 %v1096_v25 }
 0x2e9   :  { %v1647_v7 = vpop.eup %1646  ;;  %1191 = vst.msk [vmem:[%s2139_s7 + $0x78] sm:$0xff] %vm1175_vm3, %v1645_v29  ;;  %1664 = vpow2.f32 %v1297_v4  ;;  %v1517_v30 = vpop.f32.mrb[44].mxu0 }
 0x2ea   :  { %v1649_v31 = vpop.eup %1648  ;;  %1189 = vst.msk [vmem:[%s2139_s7 + $0x68] sm:$0xff] %vm1175_vm3, %v1647_v7  ;;  %1666 = vpow2.f32 %v1295_v26  ;;  %v977_v32 = vadd.f32 %v1517_v30, %v1970_v18  ;;  %v968_v33 = vpop.f32.mrb[45].mxu0 }
 0x2eb   :  { %v1651_v34 = vpop.eup %1650  ;;  %v1101_v35 = vadd.f32 1.0, %v1649_v31  ;;  %1668 = vpow2.f32 %v1298_v28  ;;  %v969_v36 = vadd.f32 %v1970_v18, %v968_v33  ;;  %v1518_v37 = vpop.f32.mrb[46].mxu0 }
 0x2ec   :  { %v1653_v38 = vpop.eup %1652  ;;  %v1099_v39 = vadd.f32 1.0, %v1651_v34  ;;  %1670 = vpow2.f32 %v1296_v42  ;;  %v980_v40 = vadd.f32 %v1518_v37, %v1970_v18  ;;  %v971_v41 = vpop.f32.mrb[47].mxu0  ;;  %v1301_v45 = vmul.f32 -1.442695, %v977_v32 }
 0x2ed   :  { %v1655_v43 = vpop.eup %1654  ;;  %1672 = vrcp.f32 %v1101_v35  ;;  %v1102_v44 = vadd.f32 1.0, %v1653_v38  ;;  %v972_v46 = vadd.f32 %v1970_v18, %v971_v41  ;;  %v1299_v48 = vmul.f32 -1.442695, %v969_v36 }
 0x2ee   :  { %1674 = vrcp.f32 %v1099_v39  ;;  %v1100_v47 = vadd.f32 1.0, %v1655_v43  ;;  %v1302_v50 = vmul.f32 -1.442695, %v980_v40 }
 0x2ef   :  { %v1657_v49 = vpop.eup %1656  ;;  %1676 = vrcp.f32 %v1102_v44  ;;  %v1300_v52 = vmul.f32 -1.442695, %v972_v46 }
 0x2f0   :  { %v1659_v51 = vpop.eup %1658  ;;  %1194 = vst.msk [vmem:[%s2139_s7 + $0x90] sm:$0xff] %vm1175_vm3, %v1657_v49  ;;  %1678 = vrcp.f32 %v1100_v47 }
 0x2f1   :  { %v1661_v53 = vpop.eup %1660  ;;  %1192 = vst.msk [vmem:[%s2139_s7 + $0x80] sm:$0xff] %vm1175_vm3, %v1659_v51  ;;  %1680 = vpow2.f32 %v1301_v45 }
 0x2f2   :  { %v1663_v18 = vpop.eup %1662  ;;  %1195 = vst.msk [vmem:[%s2139_s7 + $0x98] sm:$0xff] %vm1175_vm3, %v1661_v53  ;;  %1682 = vpow2.f32 %v1299_v48 }
 0x2f3   :  { %v1665_v54 = vpop.eup %1664  ;;  %1193 = vst.msk [vmem:[%s2139_s7 + $0x88] sm:$0xff] %vm1175_vm3, %v1663_v18  ;;  %1684 = vpow2.f32 %v1302_v50 }
 0x2f4   :  { %v1667_v55 = vpop.eup %1666  ;;  %v1105_v56 = vadd.f32 1.0, %v1665_v54  ;;  %1686 = vpow2.f32 %v1300_v52 }
 0x2f5   :  { %v1669_v57 = vpop.eup %1668  ;;  %v1103_v58 = vadd.f32 1.0, %v1667_v55 }
 0x2f6   :  { %v1671_v59 = vpop.eup %1670  ;;  %1688 = vrcp.f32 %v1105_v56  ;;  %v1106_v60 = vadd.f32 1.0, %v1669_v57 }
 0x2f7   :  { %v1673_v61 = vpop.eup %1672  ;;  %1690 = vrcp.f32 %v1103_v58  ;;  %v1104_v62 = vadd.f32 1.0, %v1671_v59 }
 0x2f8   :  { %v1675_v63 = vpop.eup %1674  ;;  %1198 = vst.msk [vmem:[%s2139_s7 + $0xb0] sm:$0xff] %vm1175_vm3, %v1673_v61  ;;  %1692 = vrcp.f32 %v1106_v60 }
 0x2f9   :  { %v1677_v0 = vpop.eup %1676  ;;  %1196 = vst.msk [vmem:[%s2139_s7 + $0xa0] sm:$0xff] %vm1175_vm3, %v1675_v63  ;;  %1694 = vrcp.f32 %v1104_v62 }
 0x2fa   :  { %v1679_v1 = vpop.eup %1678  ;;  %1199 = vst.msk [vmem:[%s2139_s7 + $0xb8] sm:$0xff] %vm1175_vm3, %v1677_v0 }
 0x2fb   :  { %v1681_v2 = vpop.eup %1680  ;;  %1197 = vst.msk [vmem:[%s2139_s7 + $0xa8] sm:$0xff] %vm1175_vm3, %v1679_v1 }
 0x2fc   :  { %v1683_v3 = vpop.eup %1682  ;;  %v1109_v5 = vadd.f32 1.0, %v1681_v2 }
 0x2fd   :  { %v1685_v6 = vpop.eup %1684  ;;  %v1107_v8 = vadd.f32 1.0, %v1683_v3 }
 0x2fe   :  { %v1687_v9 = vpop.eup %1686  ;;  %1696 = vrcp.f32 %v1109_v5  ;;  %v1110_v10 = vadd.f32 1.0, %v1685_v6 }
 0x2ff   :  { %1698 = vrcp.f32 %v1107_v8  ;;  %v1108_v11 = vadd.f32 1.0, %v1687_v9 }
 0x300   :  { %v1689_v12 = vpop.eup %1688  ;;  %1700 = vrcp.f32 %v1110_v10 }
 0x301   :  { %v1691_v13 = vpop.eup %1690  ;;  %1202 = vst.msk [vmem:[%s2139_s7 + $0xd0] sm:$0xff] %vm1175_vm3, %v1689_v12  ;;  %1702 = vrcp.f32 %v1108_v11 }
 0x302   :  { %v1693_v14 = vpop.eup %1692  ;;  %1200 = vst.msk [vmem:[%s2139_s7 + $0xc0] sm:$0xff] %vm1175_vm3, %v1691_v13 }
 0x303   :  { %v1695_v15 = vpop.eup %1694  ;;  %1203 = vst.msk [vmem:[%s2139_s7 + $0xd8] sm:$0xff] %vm1175_vm3, %v1693_v14 }
 0x304   :  { %1201 = vst.msk [vmem:[%s2139_s7 + $0xc8] sm:$0xff] %vm1175_vm3, %v1695_v15 }
 0x308   :  { %v1697_v16 = vpop.eup %1696 }
 0x309   :  { %v1699_v17 = vpop.eup %1698  ;;  %1206 = vst.msk [vmem:[%s2139_s7 + $0xf0] sm:$0xff] %vm1175_vm3, %v1697_v16 }
 0x30a   :  { %v1701_v19 = vpop.eup %1700  ;;  %1204 = vst.msk [vmem:[%s2139_s7 + $0xe0] sm:$0xff] %vm1175_vm3, %v1699_v17 }
 0x30b   :  { %v1703_v20 = vpop.eup %1702  ;;  %1207 = vst.msk [vmem:[%s2139_s7 + $0xf8] sm:$0xff] %vm1175_vm3, %v1701_v19 }
 0x30c   :  { %1205 = vst.msk [vmem:[%s2139_s7 + $0xe8] sm:$0xff] %vm1175_vm3, %v1703_v20 }

</bundles_post_ra>
